<compile_context>
chip_gen: v6e
topology: v6e:2x2x1
jax: 0.10.0
libtpu: 0.0.40
codegen_flags: <defaults>
</compile_context>

<pallas_src>
import functools

import jax
import jax.numpy as jnp
from jax.experimental import pallas as pl
from jax.experimental.pallas import tpu as pltpu

SUB = 8                # sublane granularity (padding granularity only)
LANE = 128             # lane width
MAX_BLOCK_ROWS = 1024  # rows of 128 lanes per grid step / single-slab fast-path cap


def _pow(x, gamma):
    """EUP-friendly pow for the common exponents; generic fallback otherwise."""
    if gamma == 0.25:
        return jnp.sqrt(jnp.sqrt(x))
    if gamma == 0.5:
        return jnp.sqrt(x)
    if gamma == 1.0:
        return x
    if gamma == 2.0:
        return x * x
    return jnp.power(x, gamma)


def _bce_elem(t, p):
    """PyTorch binary_cross_entropy per-element term (log clamp at -100)."""
    log_p = jnp.maximum(jnp.log(p), -100.0)
    log_1mp = jnp.maximum(jnp.log(1.0 - p), -100.0)
    return -(t * log_p + (1.0 - t) * log_1mp)


def _focal_weight(t, p, alpha, gamma):
    pt = (1.0 - p) * t + p * (1.0 - t)
    return (alpha * t + (1.0 - alpha) * (1.0 - t)) * _pow(pt, gamma)


# ----------------------------------------------------------------------------
# Fast path: the whole (padded) tensor is one VMEM slab -> single pass.
# ----------------------------------------------------------------------------
def _focal_loss_small_kernel(t_ref, p_ref, o_ref, *, alpha, gamma, inv_n):
    t = t_ref[...]
    p = p_ref[...]
    bce_mean = jnp.sum(_bce_elem(t, p)) * inv_n            # one XLU reduce, 1/n baked in
    o_ref[...] = bce_mean * _focal_weight(t, p, alpha, gamma)


# ----------------------------------------------------------------------------
# General path: 2-phase grid (phase 0 = BCE sum, phase 1 = scaled focal output).
# ----------------------------------------------------------------------------
def _focal_loss_kernel(t_ref, p_ref, o_ref, acc_ref, mean_ref, *, alpha, gamma, inv_n):
    phase = pl.program_id(0)
    i = pl.program_id(1)

    # -------- phase 0: accumulate BCE elementwise, reduce once at the end --------
    @pl.when(phase == 0)
    def _():
        @pl.when(i == 0)
        def _():
            acc_ref[...] = jnp.zeros_like(acc_ref)

        acc_ref[...] += _bce_elem(t_ref[...], p_ref[...])   # pure VPU add per step

        @pl.when(i == pl.num_programs(1) - 1)
        def _():
            # single cross-lane/sublane reduce; 1/n baked as a constant
            mean_ref[...] = jnp.sum(acc_ref[...], axis=(0, 1), keepdims=True) * inv_n

    # -------- phase 1: loss = bce_mean * focal_weight --------
    @pl.when(phase == 1)
    def _():
        fw = _focal_weight(t_ref[...], p_ref[...], alpha, gamma)
        o_ref[...] = mean_ref[...] * fw    # (1,1) broadcast against the block


def focal_loss(target, pred, alpha=2.0, gamma=0.25):
    orig_shape = target.shape
    t_flat = target.astype(jnp.float32).reshape(-1)
    p_flat = pred.astype(jnp.float32).reshape(-1)

    n = t_flat.shape[0]
    rows_raw = pl.cdiv(n, LANE)
    alpha = float(alpha)
    gamma = float(gamma)
    inv_n = 1.0 / float(n)

    if rows_raw <= MAX_BLOCK_ROWS:
        # ---------------- single-slab fast path ----------------
        rows = ((rows_raw + SUB - 1) // SUB) * SUB
        pad = rows * LANE - n
        if pad:
            # (t=1, p=1) pads contribute exactly 0 to the BCE sum; tail sliced off below.
            t_flat = jnp.pad(t_flat, (0, pad), constant_values=1.0)
            p_flat = jnp.pad(p_flat, (0, pad), constant_values=1.0)
        t2 = t_flat.reshape(rows, LANE)
        p2 = p_flat.reshape(rows, LANE)

        loss2 = pl.pallas_call(
            functools.partial(_focal_loss_small_kernel,
                              alpha=alpha, gamma=gamma, inv_n=inv_n),
            out_shape=jax.ShapeDtypeStruct((rows, LANE), jnp.float32),
        )(t2, p2)
    else:
        # ---------------- 2-phase tiled path ----------------
        block_rows = MAX_BLOCK_ROWS
        num_blocks = pl.cdiv(rows_raw, block_rows)
        rows = num_blocks * block_rows
        pad = rows * LANE - n

        if pad:
            t_flat = jnp.pad(t_flat, (0, pad), constant_values=1.0)
            p_flat = jnp.pad(p_flat, (0, pad), constant_values=1.0)

        t2 = t_flat.reshape(rows, LANE)
        p2 = p_flat.reshape(rows, LANE)

        in_spec = pl.BlockSpec((block_rows, LANE), lambda ph, i: (i, 0))
        # During phase 0 the output block index stays at 0, so nothing uninitialized is
        # ever written back to HBM; phase 1 writes each block exactly once.
        out_spec = pl.BlockSpec((block_rows, LANE), lambda ph, i: (i * ph, 0))

        loss2 = pl.pallas_call(
            functools.partial(_focal_loss_kernel,
                              alpha=alpha, gamma=gamma, inv_n=inv_n),
            out_shape=jax.ShapeDtypeStruct((rows, LANE), jnp.float32),
            grid_spec=pltpu.PrefetchScalarGridSpec(
                num_scalar_prefetch=0,
                grid=(2, num_blocks),                      # (phase, block)
                in_specs=[in_spec, in_spec],
                out_specs=out_spec,
                scratch_shapes=[
                    pltpu.VMEM((block_rows, LANE), jnp.float32),  # BCE accumulator
                    pltpu.VMEM((1, 1), jnp.float32),              # bce_mean scalar
                ],
            ),
            compiler_params=pltpu.CompilerParams(
                dimension_semantics=("arbitrary", "arbitrary")),
        )(t2, p2)

    flat = loss2.reshape(-1)
    if pad:
        flat = flat[:n]
    return flat.reshape(orig_shape)


def focal_loss_ref(target, pred, alpha=2.0, gamma=0.25):
    target = target.astype(jnp.float32)
    pred = pred.astype(jnp.float32)
    pt = (1.0 - pred) * target + pred * (1.0 - target)
    fw = (alpha * target + (1.0 - alpha) * (1.0 - target)) * jnp.power(pt, gamma)
    bce = -(target * jnp.maximum(jnp.log(pred), -100.0)
            + (1.0 - target) * jnp.maximum(jnp.log(1.0 - pred), -100.0))
    return jnp.mean(bce) * fw


if __name__ == "__main__":
    key = jax.random.PRNGKey(0)
    k1, k2 = jax.random.split(key)

    # NCHW-style input, matching the module's expected usage.
    shape = (2, 4, 16, 16)
    pred = jax.nn.sigmoid(jax.random.normal(k1, shape, dtype=jnp.float32))
    target = jax.random.bernoulli(k2, p=0.3, shape=shape).astype(jnp.float32)

    out = jax.block_until_ready(focal_loss(target, pred, alpha=2.0, gamma=0.25))
    ref = focal_loss_ref(target, pred, alpha=2.0, gamma=0.25)
    assert out.shape == shape
    assert jnp.allclose(out, ref, atol=1e-5, rtol=1e-5), "mismatch vs reference"

    # Non-lane-aligned (padded) fast path.
    shape2 = (3, 5, 7, 11)
    pred2 = jax.nn.sigmoid(jax.random.normal(k1, shape2, dtype=jnp.float32))
    target2 = jax.random.bernoulli(k2, p=0.3, shape=shape2).astype(jnp.float32)
    out2 = jax.block_until_ready(focal_loss(target2, pred2))
    ref2 = focal_loss_ref(target2, pred2)
    assert out2.shape == shape2
    assert jnp.allclose(out2, ref2, atol=1e-5, rtol=1e-5), "mismatch vs reference (padded)"

    # Large shape exercising the 2-phase tiled path.
    shape3 = (4, 8, 128, 256)   # 1,048,576 elems -> 8 blocks of 1024x128
    pred3 = jax.nn.sigmoid(jax.random.normal(k1, shape3, dtype=jnp.float32))
    target3 = jax.random.bernoulli(k2, p=0.3, shape=shape3).astype(jnp.float32)
    out3 = jax.block_until_ready(focal_loss(target3, pred3))
    ref3 = focal_loss_ref(target3, pred3)
    assert out3.shape == shape3
    assert jnp.allclose(out3, ref3, atol=1e-5, rtol=1e-5), "mismatch vs reference (tiled)"

    print("KERNEL_OK")
</pallas_src>

<mosaic_0001>
module attributes {stable_mosaic.version = 11 : i64} {
  func.func @_focal_loss_small_kernel(%arg0: memref<16x128xf32, #tpu.memory_space<vmem>>, %arg1: memref<16x128xf32, #tpu.memory_space<vmem>>, %arg2: memref<16x128xf32, #tpu.memory_space<vmem>>) attributes {dimension_semantics = [], scalar_prefetch = 0 : i64, scratch_operands = 0 : i64, tpu.core_type = #tpu.core_type<tc>} {
    %c0 = arith.constant 0 : index
    %c0_0 = arith.constant 0 : index
    %0 = vector.load %arg0[%c0, %c0_0] : memref<16x128xf32, #tpu.memory_space<vmem>>, vector<16x128xf32>
    %c0_1 = arith.constant 0 : index
    %c0_2 = arith.constant 0 : index
    %1 = vector.load %arg1[%c0_1, %c0_2] : memref<16x128xf32, #tpu.memory_space<vmem>>, vector<16x128xf32>
    %2 = math.log %1 : vector<16x128xf32>
    %cst = arith.constant -1.000000e+02 : f32
    %3 = vector.broadcast %cst : f32 to vector<16x128xf32>
    %4 = arith.maximumf %2, %3 : vector<16x128xf32>
    %cst_3 = arith.constant 1.000000e+00 : f32
    %5 = vector.broadcast %cst_3 : f32 to vector<16x128xf32>
    %6 = arith.subf %5, %1 : vector<16x128xf32>
    %7 = math.log %6 : vector<16x128xf32>
    %cst_4 = arith.constant -1.000000e+02 : f32
    %8 = vector.broadcast %cst_4 : f32 to vector<16x128xf32>
    %9 = arith.maximumf %7, %8 : vector<16x128xf32>
    %10 = arith.mulf %0, %4 : vector<16x128xf32>
    %cst_5 = arith.constant 1.000000e+00 : f32
    %11 = vector.broadcast %cst_5 : f32 to vector<16x128xf32>
    %12 = arith.subf %11, %0 : vector<16x128xf32>
    %13 = arith.mulf %12, %9 : vector<16x128xf32>
    %14 = arith.addf %10, %13 : vector<16x128xf32>
    %cst_6 = arith.constant 0.000000e+00 : f32
    %15 = vector.broadcast %cst_6 : f32 to vector<16x128xf32>
    %16 = arith.subf %15, %14 : vector<16x128xf32>
    %17 = vector.shape_cast %16 : vector<16x128xf32> to vector<1x16x128xf32>
    %cst_7 = arith.constant dense<0.000000e+00> : vector<1xf32>
    %18 = vector.multi_reduction <add>, %17, %cst_7 [1, 2] : vector<1x16x128xf32> to vector<1xf32>
    %19 = vector.shape_cast %18 : vector<1xf32> to vector<1x1x1xf32>
    %20 = vector.extract %19[0, 0, 0] : f32 from vector<1x1x1xf32>
    %cst_8 = arith.constant 4.8828125E-4 : f32
    %21 = arith.mulf %20, %cst_8 : f32
    %cst_9 = arith.constant 1.000000e+00 : f32
    %22 = vector.broadcast %cst_9 : f32 to vector<16x128xf32>
    %23 = arith.subf %22, %1 : vector<16x128xf32>
    %24 = arith.mulf %23, %0 : vector<16x128xf32>
    %cst_10 = arith.constant 1.000000e+00 : f32
    %25 = vector.broadcast %cst_10 : f32 to vector<16x128xf32>
    %26 = arith.subf %25, %0 : vector<16x128xf32>
    %27 = arith.mulf %1, %26 : vector<16x128xf32>
    %28 = arith.addf %24, %27 : vector<16x128xf32>
    %cst_11 = arith.constant 2.000000e+00 : f32
    %29 = vector.broadcast %cst_11 : f32 to vector<16x128xf32>
    %30 = arith.mulf %29, %0 : vector<16x128xf32>
    %cst_12 = arith.constant 1.000000e+00 : f32
    %31 = vector.broadcast %cst_12 : f32 to vector<16x128xf32>
    %32 = arith.subf %31, %0 : vector<16x128xf32>
    %cst_13 = arith.constant -1.000000e+00 : f32
    %33 = vector.broadcast %cst_13 : f32 to vector<16x128xf32>
    %34 = arith.mulf %33, %32 : vector<16x128xf32>
    %35 = arith.addf %30, %34 : vector<16x128xf32>
    %36 = math.sqrt %28 : vector<16x128xf32>
    %37 = math.sqrt %36 : vector<16x128xf32>
    %38 = arith.mulf %35, %37 : vector<16x128xf32>
    %39 = vector.broadcast %21 : f32 to vector<16x128xf32>
    %40 = arith.mulf %39, %38 : vector<16x128xf32>
    %c0_14 = arith.constant 0 : index
    %c0_15 = arith.constant 0 : index
    %41 = vector.load %arg2[%c0_14, %c0_15] : memref<16x128xf32, #tpu.memory_space<vmem>>, vector<16x128xf32>
    tpu.vector_store %arg2[%c0_14, %c0_15], %40 {strides = array<i32>} : memref<16x128xf32, #tpu.memory_space<vmem>>, vector<16x128xf32>,
    return
  }
}

</mosaic_0001>

<bundles_post_ra>
// kernel: tpu_custom_call.1
= control target key start
LH: loop header
LB: loop body
LE: loop exit
PB: predicated region body
PF: predicated region fallthrough
CT: control target
= control target key end

     0   :  { %7 = vsyncpa [#allocation3], 0  ;;  %s293_s0 = inlined_call_operand.hbm [shape: f32[16,128], index: 0, kind: input, shape index: {}]   ;;  %s294_s1 = inlined_call_operand.hbm [shape: f32[16,128], index: 1, kind: input, shape index: {}]   ;;  %s295_s2 = inlined_call_operand.hbm [shape: f32[16,128], index: 2, kind: output, shape index: {}]  }
   0x1   :  { %8 = vsyncpa [#allocation6], 0 }
   0x2   :  { %9 = vsyncpa [#allocation4], 0  ;;  %s233_s9 = smov [#allocation2]  }
   0x3   :  { %s15_s10 = sshll.u32 %s233_s9, 4  ;;  %s16_s10 = int_to_ptr.vmem [resolvable:$true] %s15_s10 }
   0x4   :  { %s175_s11 = scalar_lea.vmem %s16_s10, 256  ;;  %p180_p1 = scmp.lt.s32.totalorder %s16_s10, %s16_s10 }
   0x5   :  { %p176_p0 = scmp.ne.s32.totalorder %s16_s10, %s175_s11  ;;  %p181_p2 = scmp.lt.s32.totalorder %s175_s11, %s175_s11 }
   0x7   :  { %p182_p3 = por %p181_p2, %p180_p1 }
   0x9   :  { %p183_p4 = pnand %p182_p3, %p176_p0 }
   0xb   :  { %186 = shalt.err (!%p183_p4)
}
   0xc   :  { %s234_s12 = smov 128   ;;  %s235_s13 = smov 8  }
   0xd   :  { %21 = dma.hbm_to_vmem [thread:$0]  %s293_s0, 256, %s16_s10, [#allocation3], %s234_s12, %s234_s12, %s235_s13  }
   0xe   :  { %s236_s16 = smov [#allocation5]  }
   0xf   :  { %s27_s17 = sshll.u32 %s236_s16, 4  ;;  %s28_s17 = int_to_ptr.vmem [resolvable:$true] %s27_s17 }
  0x10   :  { %s195_s18 = scalar_lea.vmem %s28_s17, 256  ;;  %p200_p6 = scmp.lt.s32.totalorder %s28_s17, %s28_s17 }
  0x11   :  { %p196_p5 = scmp.ne.s32.totalorder %s28_s17, %s195_s18  ;;  %p201_p7 = scmp.lt.s32.totalorder %s195_s18, %s195_s18 }
  0x13   :  { %p202_p8 = por %p201_p7, %p200_p6 }
  0x15   :  { %p203_p9 = pnand %p202_p8, %p196_p5 }
  0x17   :  { %206 = shalt.err (!%p203_p9)
}
  0x18   :  { %33 = dma.hbm_to_vmem [thread:$0]  %s294_s1, 256, %s28_s17, [#allocation6], %s234_s12, %s234_s12, %s235_s13  }
  0x19   :  { %227 = dma.done.wait [#allocation3], 256  }
  0x1a   :  { %228 = vsyncadd [#allocation3], 4294967040 }
  0x1b   :  { %229 = dma.done.wait [#allocation6], 256  }
  0x1c   :  { %230 = vsyncadd [#allocation6], 4294967040  ;;  %v265_v0 = vld [vmem:[#allocation2] sm:$0xff]  ;;  %v267_v1 = vld [vmem:[#allocation2 + $0x8] sm:$0xff]  ;;  %s237_s21 = smov [#allocation7]  }
  0x1d   :  { %v42_v2 = vld [vmem:[#allocation5] sm:$0xff]  ;;  %v43_v3 = vld [vmem:[#allocation5 + $0x8] sm:$0xff]  ;;  %v270_v5 = vsub.f32 1.0, %v265_v0  ;;  %v273_v6 = vsub.f32 1.0, %v267_v1  ;;  %v85_v56 = vmul.f32 2.0, %v265_v0  ;;  %v86_v57 = vmul.f32 2.0, %v267_v1 }
  0x1e   :  { %151 = vlog2.f32 %v42_v2  ;;  %v50_v4 = vsub.f32 1.0, %v42_v2  ;;  %v51_v7 = vsub.f32 1.0, %v43_v3  ;;  %s131_s22 = sshll.u32 %s237_s21, 4  ;;  %s132_s22 = int_to_ptr.vmem [resolvable:$true] %s131_s22 }
  0x1f   :  { %153 = vlog2.f32 %v43_v3  ;;  %v81_v9 = vmul.f32 %v270_v5, %v42_v2  ;;  %v82_v10 = vmul.f32 %v273_v6, %v43_v3  ;;  %v87_v58 = vmul.f32 -1.0, %v270_v5  ;;  %s207_s23 = scalar_lea.vmem %s132_s22, 256  ;;  %p212_p11 = scmp.lt.s32.totalorder %s132_s22, %s132_s22 }
  0x20   :  { %155 = vlog2.f32 %v50_v4  ;;  %v79_v8 = vmul.f32 %v50_v4, %v265_v0  ;;  %v80_v11 = vmul.f32 %v51_v7, %v267_v1  ;;  %v88_v59 = vmul.f32 -1.0, %v273_v6  ;;  %p208_p10 = scmp.ne.s32.totalorder %s132_s22, %s207_s23  ;;  %p213_p12 = scmp.lt.s32.totalorder %s207_s23, %s207_s23 }
  0x21   :  { %157 = vlog2.f32 %v51_v7  ;;  %v89_v2 = vadd.f32 %v87_v58, %v85_v56 }
  0x22   :  { %v83_v12 = vadd.f32 %v81_v9, %v79_v8  ;;  %v84_v13 = vadd.f32 %v82_v10, %v80_v11  ;;  %v90_v3 = vadd.f32 %v88_v59, %v86_v57  ;;  %p214_p13 = por %p213_p12, %p212_p11 }
  0x24   :  { %159 = vrsqrt.f32 %v83_v12  ;;  %vm93_vm0 = vcmp.eq.f32.partialorder %v83_v12, inf  ;;  %vm100_vm1 = vcmp.eq.f32.partialorder %v84_v13, inf  ;;  %v96_v46 = vand.u32 2147483648, %v83_v12  ;;  %p215_p0 = pnand %p214_p13, %p208_p10 }
  0x25   :  { %161 = vrsqrt.f32 %v84_v13  ;;  %vm95_vm2 = vcmp.eq.f32.partialorder %v83_v12, 0.0  ;;  %v103_v48 = vand.u32 2147483648, %v84_v13  ;;  %vm102_vm3 = vcmp.eq.f32.partialorder %v84_v13, 0.0 }
  0x2b   :  { %v152_v14 = vpop.eup %151 }
  0x2c   :  { %v154_v15 = vpop.eup %153  ;;  %v45_v16 = vmul.f32 0.6931472, %v152_v14 }
  0x2d   :  { %v156_v17 = vpop.eup %155  ;;  %v47_v18 = vmul.f32 0.6931472, %v154_v15 }
  0x2e   :  { %v158_v19 = vpop.eup %157  ;;  %v48_v20 = vmax.f32 %v45_v16, -100.0  ;;  %v53_v21 = vmul.f32 0.6931472, %v156_v17 }
  0x2f   :  { %v49_v22 = vmax.f32 %v47_v18, -100.0  ;;  %v55_v23 = vmul.f32 0.6931472, %v158_v19 }
  0x30   :  { %v56_v24 = vmax.f32 %v53_v21, -100.0  ;;  %v58_v25 = vmul.f32 %v48_v20, %v265_v0 }
  0x31   :  { %v57_v26 = vmax.f32 %v55_v23, -100.0  ;;  %v59_v27 = vmul.f32 %v49_v22, %v267_v1  ;;  %v160_v42 = vpop.eup %159 }
  0x32   :  { %v62_v28 = vmul.f32 %v270_v5, %v56_v24  ;;  %v162_v43 = vpop.eup %161  ;;  %v92_v44 = vmul.f32 %v160_v42, %v83_v12 }
  0x33   :  { %v63_v29 = vmul.f32 %v273_v6, %v57_v26  ;;  %v99_v45 = vmul.f32 %v162_v43, %v84_v13 }
  0x34   :  { %v64_v30 = vadd.f32 %v62_v28, %v58_v25  ;;  %v94_v47 = vsel %vm93_vm0, %v83_v12, %v92_v44 }
  0x35   :  { %v65_v31 = vadd.f32 %v63_v29, %v59_v27  ;;  %v101_v49 = vsel %vm100_vm1, %v84_v13, %v99_v45  ;;  %v97_v50 = vsel %vm95_vm2, %v96_v46, %v94_v47 }
  0x36   :  { %v66_v32 = vsub.f32 0.0, %v64_v30  ;;  %v104_v51 = vsel %vm102_vm3, %v103_v48, %v101_v49  ;;  %163 = vrsqrt.f32 %v97_v50  ;;  %vm107_vm4 = vcmp.eq.f32.partialorder %v97_v50, inf }
  0x37   :  { %v67_v33 = vsub.f32 0.0, %v65_v31  ;;  %165 = vrsqrt.f32 %v104_v51  ;;  %vm114_vm5 = vcmp.eq.f32.partialorder %v104_v51, inf  ;;  %v110_v60 = vand.u32 2147483648, %v97_v50 }
  0x38   :  { %v117_v61 = vand.u32 2147483648, %v104_v51  ;;  %vm109_vm6 = vcmp.eq.f32.partialorder %v97_v50, 0.0  ;;  %vm116_vm7 = vcmp.eq.f32.partialorder %v104_v51, 0.0 }
  0x39   :  { %v68_v34 = vadd.f32 %v67_v33, %v66_v32 }
  0x3b   :  { %69 = vadd.xlane.f32.xlu0 %v68_v34 }
  0x43   :  { %v164_v52 = vpop.eup %163 }
  0x44   :  { %v166_v53 = vpop.eup %165  ;;  %v106_v54 = vmul.f32 %v164_v52, %v97_v50 }
  0x45   :  { %v113_v55 = vmul.f32 %v166_v53, %v104_v51 }
  0x46   :  { %v108_v62 = vsel %vm107_vm4, %v97_v50, %v106_v54 }
  0x47   :  { %v115_v63 = vsel %vm114_vm5, %v104_v51, %v113_v55  ;;  %v111_v4 = vsel %vm109_vm6, %v110_v60, %v108_v62 }
  0x48   :  { %v118_v7 = vsel %vm116_vm7, %v117_v61, %v115_v63  ;;  %v119_v8 = vmul.f32 %v111_v4, %v89_v2 }
  0x49   :  { %v120_v9 = vmul.f32 %v118_v7, %v90_v3 }
  0xc4   :  { %v70_v35 = vpop.xlane.xlu0 %69 }
  0xc5   :  { %v71_v36 = vrot.slane %v70_v35, 4 }
  0xc7   :  { %v72_v37 = vadd.f32 %v71_v36, %v70_v35 }
  0xc9   :  { %v73_v38 = vrot.slane %v72_v37, 2 }
  0xcb   :  { %v74_v39 = vadd.f32 %v73_v38, %v72_v37 }
  0xcd   :  { %v75_v40 = vrot.slane %v74_v39, 1 }
  0xcf   :  { %v76_v41 = vadd.f32 %v75_v40, %v74_v39 }
  0xd1   :  { %144 = vpush %v76_v41 }
 0x102   :  { %s145_s0 = spop %144 }
 0x103   :  { %s78_s1 = smul.f32 0.00048828125, %s145_s0 }
 0x105   :  { %v121_v0 = vstv %s78_s1 }
 0x106   :  { %v122_v1 = vmul.f32 %v121_v0, %v119_v8  ;;  %v123_v5 = vmul.f32 %v121_v0, %v120_v9 }
 0x108   :  { %124 = vst [vmem:[#allocation7] sm:$0xff] %v122_v1  ;;  %125 = vst [vmem:[#allocation7 + $0x8] sm:$0xff] %v123_v5 }
 0x109   :  { %218 = shalt.err (!%p215_p0)
}
 0x10a   :  { %137 = dma.vmem_to_hbm [thread:$0]  %s132_s22, 256, %s295_s2, [#allocation4], %s234_s12, %s234_s12, %s235_s13  }
 0x10b   :  { %231 = dma.done.wait [#allocation4], 256  }
 0x10c   :  { %232 = vsyncadd [#allocation4], 4294967040 }
 0x10d   :  { %141 = vsyncpa [#allocation3], 1 }
 0x10e   :  { %142 = vsyncpa [#allocation6], 1 }
 0x10f   :  { %143 = vsyncpa [#allocation4], 1 }

</bundles_post_ra>
